<compile_context>
chip_gen: v6e
topology: v6e:2x2x1
jax: 0.10.0
libtpu: 0.0.40
codegen_flags: <defaults>
</compile_context>

<pallas_src>
import jax
import jax.numpy as jnp
from jax.experimental import pallas as pl
from jax.experimental.pallas import tpu as pltpu

HIDDEN_SIZE = 64
INPUT_SIZE = 4
OUTPUT_SIZE = 1


def lstm_fc_kernel(x_ref, wih_ref, whh_ref, b_ref, fcw_ref, fcb_ref, out_ref):
    """Full LSTM recurrence + final Linear, fused-gate formulation.

    x_ref:   (S*B, I)  time-major rows (row t*B + b is timestep t, batch b)
    wih_ref: (I, 4H)   fused input->hidden weights, gate column order (i, f, o, g)
    whh_ref: (H, 4H)   fused hidden->hidden weights, gate column order (i, f, o, g)
    b_ref:   (1, 4H)   fused combined bias (b_ih + b_hh), gate order (i, f, o, g)
    fcw_ref: (1, H)    final linear weight
    fcb_ref: (1, 1)    final linear bias (SMEM scalar)
    out_ref: (B, 1)    output
    """
    SB, _ = x_ref.shape
    H4 = whh_ref.shape[-1]
    H = H4 // 4
    B = out_ref.shape[0]
    S = SB // B

    # Hoisted input projection + bias for ALL timesteps at once (single MXU pass).
    xw = (
        jnp.dot(x_ref[...], wih_ref[...], preferred_element_type=jnp.float32)
        + b_ref[...]
    )  # (S*B, 4H)

    h = jnp.zeros((B, H), jnp.float32)
    c = jnp.zeros((B, H), jnp.float32)

    # S is tiny and static -> fully unrolled recurrence (one fused matmul per step).
    for t in range(S):
        gates = xw[t * B:(t + 1) * B, :] + jnp.dot(
            h, whh_ref[...], preferred_element_type=jnp.float32
        )  # (B, 4H), gate order (i, f, o, g)

        sig = jax.nn.sigmoid(gates[:, : 3 * H])      # one EUP group: i, f, o
        g_g = jnp.tanh(gates[:, 3 * H:])             # one EUP group: g
        i_g = sig[:, :H]
        f_g = sig[:, H: 2 * H]
        o_g = sig[:, 2 * H: 3 * H]

        c = f_g * c + i_g * g_g
        h = o_g * jnp.tanh(c)

    # Dropout is identity at inference; final Linear (N=1) as VPU mul + lane reduce.
    out_ref[...] = (
        jnp.sum(h * fcw_ref[...], axis=-1, keepdims=True) + fcb_ref[0, 0]
    )


def lstm_model_forward(x, W_ih, W_hh, b_ih, b_hh, fc_w, fc_b):
    """x: (batch, seq, input) float32 — same convention as the PyTorch module (batch_first)."""
    B, S, I = x.shape
    H = W_hh.shape[1]

    # Gate reorder: PyTorch stacks (i, f, g, o); we use (i, f, o, g) so the sigmoid gates
    # are one contiguous (·, 3H) slab and tanh is the trailing (·, H) slab.
    order = jnp.array([0, 1, 3, 2], dtype=jnp.int32)

    # Wrapper-side parameter plumbing (reshape / transpose / concat only; compute is in-kernel).
    x_tm = (
        jnp.transpose(x, (1, 0, 2)).reshape(S * B, I).astype(jnp.float32)
    )  # (S*B, I), time-major rows

    wih = (
        jnp.transpose(W_ih.reshape(4, H, I)[order], (2, 0, 1))
        .reshape(I, 4 * H)
        .astype(jnp.float32)
    )  # (I, 4H)
    whh = (
        jnp.transpose(W_hh.reshape(4, H, H)[order], (2, 0, 1))
        .reshape(H, 4 * H)
        .astype(jnp.float32)
    )  # (H, 4H)
    b = (b_ih + b_hh).reshape(4, H)[order].reshape(1, 4 * H).astype(jnp.float32)  # (1, 4H)
    fcw = fc_w.reshape(1, H).astype(jnp.float32)   # (1, H)
    fcb = fc_b.reshape(1, 1).astype(jnp.float32)   # (1, 1) scalar -> SMEM

    return pl.pallas_call(
        lstm_fc_kernel,
        out_shape=jax.ShapeDtypeStruct((B, OUTPUT_SIZE), jnp.float32),
        in_specs=[
            pl.BlockSpec(memory_space=pltpu.MemorySpace.VMEM),  # x (time-major rows)
            pl.BlockSpec(memory_space=pltpu.MemorySpace.VMEM),  # wih fused
            pl.BlockSpec(memory_space=pltpu.MemorySpace.VMEM),  # whh fused
            pl.BlockSpec(memory_space=pltpu.MemorySpace.VMEM),  # fused bias
            pl.BlockSpec(memory_space=pltpu.MemorySpace.VMEM),  # fc weight
            pl.BlockSpec(memory_space=pltpu.MemorySpace.SMEM),  # fc bias scalar
        ],
        out_specs=pl.BlockSpec(memory_space=pltpu.MemorySpace.VMEM),
    )(x_tm, wih, whh, b, fcw, fcb)


def ref_forward(x, W_ih, W_hh, b_ih, b_hh, fc_w, fc_b):
    """Pure-JAX reference matching torch.nn.LSTM + Linear semantics (eval mode)."""
    B, S, I = x.shape
    H = W_hh.shape[1]
    h = jnp.zeros((B, H), jnp.float32)
    c = jnp.zeros((B, H), jnp.float32)
    for t in range(S):
        gates = x[:, t] @ W_ih.T + b_ih + h @ W_hh.T + b_hh
        i, f, g, o = jnp.split(gates, 4, axis=-1)
        i = jax.nn.sigmoid(i)
        f = jax.nn.sigmoid(f)
        g = jnp.tanh(g)
        o = jax.nn.sigmoid(o)
        c = f * c + i * g
        h = o * jnp.tanh(c)
    return h @ fc_w.T + fc_b


if __name__ == "__main__":
    B, S = 2, 8
    H, I = HIDDEN_SIZE, INPUT_SIZE

    key = jax.random.PRNGKey(0)
    k_x, k_wih, k_whh, k_bih, k_bhh, k_fcw, k_fcb = jax.random.split(key, 7)

    # Deterministic init matching PyTorch's default U(-1/sqrt(H), 1/sqrt(H)) shapes.
    bound = 1.0 / jnp.sqrt(jnp.float32(H))
    x = jax.random.normal(k_x, (B, S, I), dtype=jnp.float32)
    W_ih = jax.random.uniform(k_wih, (4 * H, I), minval=-bound, maxval=bound, dtype=jnp.float32)
    W_hh = jax.random.uniform(k_whh, (4 * H, H), minval=-bound, maxval=bound, dtype=jnp.float32)
    b_ih = jax.random.uniform(k_bih, (4 * H,), minval=-bound, maxval=bound, dtype=jnp.float32)
    b_hh = jax.random.uniform(k_bhh, (4 * H,), minval=-bound, maxval=bound, dtype=jnp.float32)
    fc_w = jax.random.uniform(k_fcw, (OUTPUT_SIZE, H), minval=-bound, maxval=bound, dtype=jnp.float32)
    fc_b = jax.random.uniform(k_fcb, (OUTPUT_SIZE,), minval=-bound, maxval=bound, dtype=jnp.float32)

    out = lstm_model_forward(x, W_ih, W_hh, b_ih, b_hh, fc_w, fc_b)
    out = jax.block_until_ready(out)

    ref = ref_forward(x, W_ih, W_hh, b_ih, b_hh, fc_w, fc_b)
    assert out.shape == (B, OUTPUT_SIZE), out.shape
    assert jnp.allclose(out, ref, atol=1e-5, rtol=1e-4), (out, ref)

    print("KERNEL_OK")
</pallas_src>

<mosaic_0001>
module attributes {stable_mosaic.version = 11 : i64} {
  func.func @lstm_fc_kernel(%arg0: memref<16x4xf32, #tpu.memory_space<vmem>>, %arg1: memref<4x256xf32, #tpu.memory_space<vmem>>, %arg2: memref<64x256xf32, #tpu.memory_space<vmem>>, %arg3: memref<1x256xf32, #tpu.memory_space<vmem>>, %arg4: memref<1x64xf32, #tpu.memory_space<vmem>>, %arg5: memref<1x1xf32, #tpu.memory_space<smem>>, %arg6: memref<2x1xf32, #tpu.memory_space<vmem>>) attributes {dimension_semantics = [], scalar_prefetch = 0 : i64, scratch_operands = 0 : i64, tpu.core_type = #tpu.core_type<tc>} {
    %c0 = arith.constant 0 : index
    %c0_0 = arith.constant 0 : index
    %0 = vector.load %arg0[%c0, %c0_0] : memref<16x4xf32, #tpu.memory_space<vmem>>, vector<16x4xf32>
    %c0_1 = arith.constant 0 : index
    %c0_2 = arith.constant 0 : index
    %1 = vector.load %arg1[%c0_1, %c0_2] : memref<4x256xf32, #tpu.memory_space<vmem>>, vector<4x256xf32>
    %cst = arith.constant dense<0.000000e+00> : vector<16x256xf32>
    %2 = tpu.matmul %0, %1, %cst {dimension_numbers = #tpu.dot_dimension_numbers<[1], [0], [0], [1], [0, 0, 1, 1], [], []>} : vector<16x4xf32>, vector<4x256xf32>, vector<16x256xf32> -> vector<16x256xf32>
    %c0_3 = arith.constant 0 : index
    %c0_4 = arith.constant 0 : index
    %3 = vector.load %arg3[%c0_3, %c0_4] : memref<1x256xf32, #tpu.memory_space<vmem>>, vector<1x256xf32>
    %4 = vector.broadcast %3 : vector<1x256xf32> to vector<16x256xf32>
    %5 = arith.addf %2, %4 : vector<16x256xf32>
    %cst_5 = arith.constant 0.000000e+00 : f32
    %6 = vector.broadcast %cst_5 : f32 to vector<2x64xf32>
    %cst_6 = arith.constant 0.000000e+00 : f32
    %7 = vector.broadcast %cst_6 : f32 to vector<2x64xf32>
    %8 = vector.extract_strided_slice %5 {offsets = [0, 0], sizes = [2, 256], strides = [1, 1]} : vector<16x256xf32> to vector<2x256xf32>
    %c0_7 = arith.constant 0 : index
    %c0_8 = arith.constant 0 : index
    %9 = vector.load %arg2[%c0_7, %c0_8] : memref<64x256xf32, #tpu.memory_space<vmem>>, vector<64x256xf32>
    %cst_9 = arith.constant dense<0.000000e+00> : vector<2x256xf32>
    %10 = tpu.matmul %6, %9, %cst_9 {dimension_numbers = #tpu.dot_dimension_numbers<[1], [0], [0], [1], [0, 0, 1, 1], [], []>} : vector<2x64xf32>, vector<64x256xf32>, vector<2x256xf32> -> vector<2x256xf32>
    %11 = arith.addf %8, %10 : vector<2x256xf32>
    %12 = vector.extract_strided_slice %11 {offsets = [0, 0], sizes = [2, 192], strides = [1, 1]} : vector<2x256xf32> to vector<2x192xf32>
    %13 = arith.negf %12 : vector<2x192xf32>
    %14 = math.exp %13 : vector<2x192xf32>
    %cst_10 = arith.constant 1.000000e+00 : f32
    %15 = vector.broadcast %cst_10 : f32 to vector<2x192xf32>
    %16 = arith.addf %15, %14 : vector<2x192xf32>
    %17 = arith.divf %15, %16 : vector<2x192xf32>
    %18 = vector.extract_strided_slice %11 {offsets = [0, 192], sizes = [2, 64], strides = [1, 1]} : vector<2x256xf32> to vector<2x64xf32>
    %19 = math.tanh %18 : vector<2x64xf32>
    %20 = vector.extract_strided_slice %17 {offsets = [0, 0], sizes = [2, 64], strides = [1, 1]} : vector<2x192xf32> to vector<2x64xf32>
    %21 = vector.extract_strided_slice %17 {offsets = [0, 64], sizes = [2, 64], strides = [1, 1]} : vector<2x192xf32> to vector<2x64xf32>
    %22 = vector.extract_strided_slice %17 {offsets = [0, 128], sizes = [2, 64], strides = [1, 1]} : vector<2x192xf32> to vector<2x64xf32>
    %23 = arith.mulf %21, %7 : vector<2x64xf32>
    %24 = arith.mulf %20, %19 : vector<2x64xf32>
    %25 = arith.addf %23, %24 : vector<2x64xf32>
    %26 = math.tanh %25 : vector<2x64xf32>
    %27 = arith.mulf %22, %26 : vector<2x64xf32>
    %28 = vector.extract_strided_slice %5 {offsets = [2, 0], sizes = [2, 256], strides = [1, 1]} : vector<16x256xf32> to vector<2x256xf32>
    %c0_11 = arith.constant 0 : index
    %c0_12 = arith.constant 0 : index
    %29 = vector.load %arg2[%c0_11, %c0_12] : memref<64x256xf32, #tpu.memory_space<vmem>>, vector<64x256xf32>
    %cst_13 = arith.constant dense<0.000000e+00> : vector<2x256xf32>
    %30 = tpu.matmul %27, %29, %cst_13 {dimension_numbers = #tpu.dot_dimension_numbers<[1], [0], [0], [1], [0, 0, 1, 1], [], []>} : vector<2x64xf32>, vector<64x256xf32>, vector<2x256xf32> -> vector<2x256xf32>
    %31 = arith.addf %28, %30 : vector<2x256xf32>
    %32 = vector.extract_strided_slice %31 {offsets = [0, 0], sizes = [2, 192], strides = [1, 1]} : vector<2x256xf32> to vector<2x192xf32>
    %33 = arith.negf %32 : vector<2x192xf32>
    %34 = math.exp %33 : vector<2x192xf32>
    %cst_14 = arith.constant 1.000000e+00 : f32
    %35 = vector.broadcast %cst_14 : f32 to vector<2x192xf32>
    %36 = arith.addf %35, %34 : vector<2x192xf32>
    %37 = arith.divf %35, %36 : vector<2x192xf32>
    %38 = vector.extract_strided_slice %31 {offsets = [0, 192], sizes = [2, 64], strides = [1, 1]} : vector<2x256xf32> to vector<2x64xf32>
    %39 = math.tanh %38 : vector<2x64xf32>
    %40 = vector.extract_strided_slice %37 {offsets = [0, 0], sizes = [2, 64], strides = [1, 1]} : vector<2x192xf32> to vector<2x64xf32>
    %41 = vector.extract_strided_slice %37 {offsets = [0, 64], sizes = [2, 64], strides = [1, 1]} : vector<2x192xf32> to vector<2x64xf32>
    %42 = vector.extract_strided_slice %37 {offsets = [0, 128], sizes = [2, 64], strides = [1, 1]} : vector<2x192xf32> to vector<2x64xf32>
    %43 = arith.mulf %41, %25 : vector<2x64xf32>
    %44 = arith.mulf %40, %39 : vector<2x64xf32>
    %45 = arith.addf %43, %44 : vector<2x64xf32>
    %46 = math.tanh %45 : vector<2x64xf32>
    %47 = arith.mulf %42, %46 : vector<2x64xf32>
    %48 = vector.extract_strided_slice %5 {offsets = [4, 0], sizes = [2, 256], strides = [1, 1]} : vector<16x256xf32> to vector<2x256xf32>
    %c0_15 = arith.constant 0 : index
    %c0_16 = arith.constant 0 : index
    %49 = vector.load %arg2[%c0_15, %c0_16] : memref<64x256xf32, #tpu.memory_space<vmem>>, vector<64x256xf32>
    %cst_17 = arith.constant dense<0.000000e+00> : vector<2x256xf32>
    %50 = tpu.matmul %47, %49, %cst_17 {dimension_numbers = #tpu.dot_dimension_numbers<[1], [0], [0], [1], [0, 0, 1, 1], [], []>} : vector<2x64xf32>, vector<64x256xf32>, vector<2x256xf32> -> vector<2x256xf32>
    %51 = arith.addf %48, %50 : vector<2x256xf32>
    %52 = vector.extract_strided_slice %51 {offsets = [0, 0], sizes = [2, 192], strides = [1, 1]} : vector<2x256xf32> to vector<2x192xf32>
    %53 = arith.negf %52 : vector<2x192xf32>
    %54 = math.exp %53 : vector<2x192xf32>
    %cst_18 = arith.constant 1.000000e+00 : f32
    %55 = vector.broadcast %cst_18 : f32 to vector<2x192xf32>
    %56 = arith.addf %55, %54 : vector<2x192xf32>
    %57 = arith.divf %55, %56 : vector<2x192xf32>
    %58 = vector.extract_strided_slice %51 {offsets = [0, 192], sizes = [2, 64], strides = [1, 1]} : vector<2x256xf32> to vector<2x64xf32>
    %59 = math.tanh %58 : vector<2x64xf32>
    %60 = vector.extract_strided_slice %57 {offsets = [0, 0], sizes = [2, 64], strides = [1, 1]} : vector<2x192xf32> to vector<2x64xf32>
    %61 = vector.extract_strided_slice %57 {offsets = [0, 64], sizes = [2, 64], strides = [1, 1]} : vector<2x192xf32> to vector<2x64xf32>
    %62 = vector.extract_strided_slice %57 {offsets = [0, 128], sizes = [2, 64], strides = [1, 1]} : vector<2x192xf32> to vector<2x64xf32>
    %63 = arith.mulf %61, %45 : vector<2x64xf32>
    %64 = arith.mulf %60, %59 : vector<2x64xf32>
    %65 = arith.addf %63, %64 : vector<2x64xf32>
    %66 = math.tanh %65 : vector<2x64xf32>
    %67 = arith.mulf %62, %66 : vector<2x64xf32>
    %68 = vector.extract_strided_slice %5 {offsets = [6, 0], sizes = [2, 256], strides = [1, 1]} : vector<16x256xf32> to vector<2x256xf32>
    %c0_19 = arith.constant 0 : index
    %c0_20 = arith.constant 0 : index
    %69 = vector.load %arg2[%c0_19, %c0_20] : memref<64x256xf32, #tpu.memory_space<vmem>>, vector<64x256xf32>
    %cst_21 = arith.constant dense<0.000000e+00> : vector<2x256xf32>
    %70 = tpu.matmul %67, %69, %cst_21 {dimension_numbers = #tpu.dot_dimension_numbers<[1], [0], [0], [1], [0, 0, 1, 1], [], []>} : vector<2x64xf32>, vector<64x256xf32>, vector<2x256xf32> -> vector<2x256xf32>
    %71 = arith.addf %68, %70 : vector<2x256xf32>
    %72 = vector.extract_strided_slice %71 {offsets = [0, 0], sizes = [2, 192], strides = [1, 1]} : vector<2x256xf32> to vector<2x192xf32>
    %73 = arith.negf %72 : vector<2x192xf32>
    %74 = math.exp %73 : vector<2x192xf32>
    %cst_22 = arith.constant 1.000000e+00 : f32
    %75 = vector.broadcast %cst_22 : f32 to vector<2x192xf32>
    %76 = arith.addf %75, %74 : vector<2x192xf32>
    %77 = arith.divf %75, %76 : vector<2x192xf32>
    %78 = vector.extract_strided_slice %71 {offsets = [0, 192], sizes = [2, 64], strides = [1, 1]} : vector<2x256xf32> to vector<2x64xf32>
    %79 = math.tanh %78 : vector<2x64xf32>
    %80 = vector.extract_strided_slice %77 {offsets = [0, 0], sizes = [2, 64], strides = [1, 1]} : vector<2x192xf32> to vector<2x64xf32>
    %81 = vector.extract_strided_slice %77 {offsets = [0, 64], sizes = [2, 64], strides = [1, 1]} : vector<2x192xf32> to vector<2x64xf32>
    %82 = vector.extract_strided_slice %77 {offsets = [0, 128], sizes = [2, 64], strides = [1, 1]} : vector<2x192xf32> to vector<2x64xf32>
    %83 = arith.mulf %81, %65 : vector<2x64xf32>
    %84 = arith.mulf %80, %79 : vector<2x64xf32>
    %85 = arith.addf %83, %84 : vector<2x64xf32>
    %86 = math.tanh %85 : vector<2x64xf32>
    %87 = arith.mulf %82, %86 : vector<2x64xf32>
    %88 = vector.extract_strided_slice %5 {offsets = [8, 0], sizes = [2, 256], strides = [1, 1]} : vector<16x256xf32> to vector<2x256xf32>
    %c0_23 = arith.constant 0 : index
    %c0_24 = arith.constant 0 : index
    %89 = vector.load %arg2[%c0_23, %c0_24] : memref<64x256xf32, #tpu.memory_space<vmem>>, vector<64x256xf32>
    %cst_25 = arith.constant dense<0.000000e+00> : vector<2x256xf32>
    %90 = tpu.matmul %87, %89, %cst_25 {dimension_numbers = #tpu.dot_dimension_numbers<[1], [0], [0], [1], [0, 0, 1, 1], [], []>} : vector<2x64xf32>, vector<64x256xf32>, vector<2x256xf32> -> vector<2x256xf32>
    %91 = arith.addf %88, %90 : vector<2x256xf32>
    %92 = vector.extract_strided_slice %91 {offsets = [0, 0], sizes = [2, 192], strides = [1, 1]} : vector<2x256xf32> to vector<2x192xf32>
    %93 = arith.negf %92 : vector<2x192xf32>
    %94 = math.exp %93 : vector<2x192xf32>
    %cst_26 = arith.constant 1.000000e+00 : f32
    %95 = vector.broadcast %cst_26 : f32 to vector<2x192xf32>
    %96 = arith.addf %95, %94 : vector<2x192xf32>
    %97 = arith.divf %95, %96 : vector<2x192xf32>
    %98 = vector.extract_strided_slice %91 {offsets = [0, 192], sizes = [2, 64], strides = [1, 1]} : vector<2x256xf32> to vector<2x64xf32>
    %99 = math.tanh %98 : vector<2x64xf32>
    %100 = vector.extract_strided_slice %97 {offsets = [0, 0], sizes = [2, 64], strides = [1, 1]} : vector<2x192xf32> to vector<2x64xf32>
    %101 = vector.extract_strided_slice %97 {offsets = [0, 64], sizes = [2, 64], strides = [1, 1]} : vector<2x192xf32> to vector<2x64xf32>
    %102 = vector.extract_strided_slice %97 {offsets = [0, 128], sizes = [2, 64], strides = [1, 1]} : vector<2x192xf32> to vector<2x64xf32>
    %103 = arith.mulf %101, %85 : vector<2x64xf32>
    %104 = arith.mulf %100, %99 : vector<2x64xf32>
    %105 = arith.addf %103, %104 : vector<2x64xf32>
    %106 = math.tanh %105 : vector<2x64xf32>
    %107 = arith.mulf %102, %106 : vector<2x64xf32>
    %108 = vector.extract_strided_slice %5 {offsets = [10, 0], sizes = [2, 256], strides = [1, 1]} : vector<16x256xf32> to vector<2x256xf32>
    %c0_27 = arith.constant 0 : index
    %c0_28 = arith.constant 0 : index
    %109 = vector.load %arg2[%c0_27, %c0_28] : memref<64x256xf32, #tpu.memory_space<vmem>>, vector<64x256xf32>
    %cst_29 = arith.constant dense<0.000000e+00> : vector<2x256xf32>
    %110 = tpu.matmul %107, %109, %cst_29 {dimension_numbers = #tpu.dot_dimension_numbers<[1], [0], [0], [1], [0, 0, 1, 1], [], []>} : vector<2x64xf32>, vector<64x256xf32>, vector<2x256xf32> -> vector<2x256xf32>
    %111 = arith.addf %108, %110 : vector<2x256xf32>
    %112 = vector.extract_strided_slice %111 {offsets = [0, 0], sizes = [2, 192], strides = [1, 1]} : vector<2x256xf32> to vector<2x192xf32>
    %113 = arith.negf %112 : vector<2x192xf32>
    %114 = math.exp %113 : vector<2x192xf32>
    %cst_30 = arith.constant 1.000000e+00 : f32
    %115 = vector.broadcast %cst_30 : f32 to vector<2x192xf32>
    %116 = arith.addf %115, %114 : vector<2x192xf32>
    %117 = arith.divf %115, %116 : vector<2x192xf32>
    %118 = vector.extract_strided_slice %111 {offsets = [0, 192], sizes = [2, 64], strides = [1, 1]} : vector<2x256xf32> to vector<2x64xf32>
    %119 = math.tanh %118 : vector<2x64xf32>
    %120 = vector.extract_strided_slice %117 {offsets = [0, 0], sizes = [2, 64], strides = [1, 1]} : vector<2x192xf32> to vector<2x64xf32>
    %121 = vector.extract_strided_slice %117 {offsets = [0, 64], sizes = [2, 64], strides = [1, 1]} : vector<2x192xf32> to vector<2x64xf32>
    %122 = vector.extract_strided_slice %117 {offsets = [0, 128], sizes = [2, 64], strides = [1, 1]} : vector<2x192xf32> to vector<2x64xf32>
    %123 = arith.mulf %121, %105 : vector<2x64xf32>
    %124 = arith.mulf %120, %119 : vector<2x64xf32>
    %125 = arith.addf %123, %124 : vector<2x64xf32>
    %126 = math.tanh %125 : vector<2x64xf32>
    %127 = arith.mulf %122, %126 : vector<2x64xf32>
    %128 = vector.extract_strided_slice %5 {offsets = [12, 0], sizes = [2, 256], strides = [1, 1]} : vector<16x256xf32> to vector<2x256xf32>
    %c0_31 = arith.constant 0 : index
    %c0_32 = arith.constant 0 : index
    %129 = vector.load %arg2[%c0_31, %c0_32] : memref<64x256xf32, #tpu.memory_space<vmem>>, vector<64x256xf32>
    %cst_33 = arith.constant dense<0.000000e+00> : vector<2x256xf32>
    %130 = tpu.matmul %127, %129, %cst_33 {dimension_numbers = #tpu.dot_dimension_numbers<[1], [0], [0], [1], [0, 0, 1, 1], [], []>} : vector<2x64xf32>, vector<64x256xf32>, vector<2x256xf32> -> vector<2x256xf32>
    %131 = arith.addf %128, %130 : vector<2x256xf32>
    %132 = vector.extract_strided_slice %131 {offsets = [0, 0], sizes = [2, 192], strides = [1, 1]} : vector<2x256xf32> to vector<2x192xf32>
    %133 = arith.negf %132 : vector<2x192xf32>
    %134 = math.exp %133 : vector<2x192xf32>
    %cst_34 = arith.constant 1.000000e+00 : f32
    %135 = vector.broadcast %cst_34 : f32 to vector<2x192xf32>
    %136 = arith.addf %135, %134 : vector<2x192xf32>
    %137 = arith.divf %135, %136 : vector<2x192xf32>
    %138 = vector.extract_strided_slice %131 {offsets = [0, 192], sizes = [2, 64], strides = [1, 1]} : vector<2x256xf32> to vector<2x64xf32>
    %139 = math.tanh %138 : vector<2x64xf32>
    %140 = vector.extract_strided_slice %137 {offsets = [0, 0], sizes = [2, 64], strides = [1, 1]} : vector<2x192xf32> to vector<2x64xf32>
    %141 = vector.extract_strided_slice %137 {offsets = [0, 64], sizes = [2, 64], strides = [1, 1]} : vector<2x192xf32> to vector<2x64xf32>
    %142 = vector.extract_strided_slice %137 {offsets = [0, 128], sizes = [2, 64], strides = [1, 1]} : vector<2x192xf32> to vector<2x64xf32>
    %143 = arith.mulf %141, %125 : vector<2x64xf32>
    %144 = arith.mulf %140, %139 : vector<2x64xf32>
    %145 = arith.addf %143, %144 : vector<2x64xf32>
    %146 = math.tanh %145 : vector<2x64xf32>
    %147 = arith.mulf %142, %146 : vector<2x64xf32>
    %148 = vector.extract_strided_slice %5 {offsets = [14, 0], sizes = [2, 256], strides = [1, 1]} : vector<16x256xf32> to vector<2x256xf32>
    %c0_35 = arith.constant 0 : index
    %c0_36 = arith.constant 0 : index
    %149 = vector.load %arg2[%c0_35, %c0_36] : memref<64x256xf32, #tpu.memory_space<vmem>>, vector<64x256xf32>
    %cst_37 = arith.constant dense<0.000000e+00> : vector<2x256xf32>
    %150 = tpu.matmul %147, %149, %cst_37 {dimension_numbers = #tpu.dot_dimension_numbers<[1], [0], [0], [1], [0, 0, 1, 1], [], []>} : vector<2x64xf32>, vector<64x256xf32>, vector<2x256xf32> -> vector<2x256xf32>
    %151 = arith.addf %148, %150 : vector<2x256xf32>
    %152 = vector.extract_strided_slice %151 {offsets = [0, 0], sizes = [2, 192], strides = [1, 1]} : vector<2x256xf32> to vector<2x192xf32>
    %153 = arith.negf %152 : vector<2x192xf32>
    %154 = math.exp %153 : vector<2x192xf32>
    %cst_38 = arith.constant 1.000000e+00 : f32
    %155 = vector.broadcast %cst_38 : f32 to vector<2x192xf32>
    %156 = arith.addf %155, %154 : vector<2x192xf32>
    %157 = arith.divf %155, %156 : vector<2x192xf32>
    %158 = vector.extract_strided_slice %151 {offsets = [0, 192], sizes = [2, 64], strides = [1, 1]} : vector<2x256xf32> to vector<2x64xf32>
    %159 = math.tanh %158 : vector<2x64xf32>
    %160 = vector.extract_strided_slice %157 {offsets = [0, 0], sizes = [2, 64], strides = [1, 1]} : vector<2x192xf32> to vector<2x64xf32>
    %161 = vector.extract_strided_slice %157 {offsets = [0, 64], sizes = [2, 64], strides = [1, 1]} : vector<2x192xf32> to vector<2x64xf32>
    %162 = vector.extract_strided_slice %157 {offsets = [0, 128], sizes = [2, 64], strides = [1, 1]} : vector<2x192xf32> to vector<2x64xf32>
    %163 = arith.mulf %161, %145 : vector<2x64xf32>
    %164 = arith.mulf %160, %159 : vector<2x64xf32>
    %165 = arith.addf %163, %164 : vector<2x64xf32>
    %166 = math.tanh %165 : vector<2x64xf32>
    %167 = arith.mulf %162, %166 : vector<2x64xf32>
    %c0_39 = arith.constant 0 : index
    %c0_40 = arith.constant 0 : index
    %168 = vector.load %arg4[%c0_39, %c0_40] : memref<1x64xf32, #tpu.memory_space<vmem>>, vector<1x64xf32>
    %169 = vector.broadcast %168 : vector<1x64xf32> to vector<2x64xf32>
    %170 = arith.mulf %167, %169 : vector<2x64xf32>
    %cst_41 = arith.constant dense<0.000000e+00> : vector<2xf32>
    %171 = vector.multi_reduction <add>, %170, %cst_41 [1] : vector<2x64xf32> to vector<2xf32>
    %172 = vector.shape_cast %171 : vector<2xf32> to vector<2x1xf32>
    %c0_42 = arith.constant 0 : index
    %c0_43 = arith.constant 0 : index
    %173 = memref.load %arg5[%c0_42, %c0_43] : memref<1x1xf32, #tpu.memory_space<smem>>
    %174 = vector.broadcast %173 : f32 to vector<2x1xf32>
    %175 = arith.addf %172, %174 : vector<2x1xf32>
    %c0_44 = arith.constant 0 : index
    %c0_45 = arith.constant 0 : index
    %176 = vector.load %arg6[%c0_44, %c0_45] : memref<2x1xf32, #tpu.memory_space<vmem>>, vector<2x1xf32>
    tpu.vector_store %arg6[%c0_44, %c0_45], %175 {strides = array<i32>} : memref<2x1xf32, #tpu.memory_space<vmem>>, vector<2x1xf32>,
    return
  }
}

</mosaic_0001>

<bundles_post_ra>
// kernel: tpu_custom_call.1
= control target key start
LH: loop header
LB: loop body
LE: loop exit
PB: predicated region body
PF: predicated region fallthrough
CT: control target
= control target key end

     0   :  { %12 = vsyncpa [#allocation4], 0  ;;  %s1245_s21 = smov [#allocation3]   ;;  %s1551_s0 = inlined_call_operand.vmem [shape: f32[16,4], index: 0, kind: input, shape index: {}]   ;;  %s1552_s1 = inlined_call_operand.vmem [shape: f32[4,256], index: 1, kind: input, shape index: {}]   ;;  %s1553_s2 = inlined_call_operand.hbm [shape: f32[64,256], index: 2, kind: input, shape index: {}]   ;;  %s1554_s3 = inlined_call_operand.vmem [shape: f32[1,256], index: 3, kind: input, shape index: {}]   ;;  %s1555_s4 = inlined_call_operand.vmem [shape: f32[1,64], index: 4, kind: input, shape index: {}]   ;;  %s1556_s5 = inlined_call_operand.<no memory space> [shape: f32[1,1], index: 5, kind: input, shape index: {}]   ;;  %s1557_s6 = inlined_call_operand.vmem [shape: f32[2,1], index: 6, kind: output, shape index: {}]  }
   0x1   :  { %s22_s22 = sshll.u32 %s1245_s21, 4  ;;  %s23_s22 = int_to_ptr.vmem [resolvable:$true] %s22_s22 }
   0x2   :  { %s1231_s23 = scalar_lea.vmem %s23_s22, 2048  ;;  %p1236_p1 = scmp.lt.s32.totalorder %s23_s22, %s23_s22 }
   0x3   :  { %p1232_p0 = scmp.ne.s32.totalorder %s23_s22, %s1231_s23  ;;  %p1237_p2 = scmp.lt.s32.totalorder %s1231_s23, %s1231_s23 }
   0x5   :  { %p1238_p3 = por %p1237_p2, %p1236_p1 }
   0x7   :  { %p1239_p4 = pnand %p1238_p3, %p1232_p0 }
   0x9   :  { %1242 = shalt.err (!%p1239_p4)
}
   0xa   :  { %s1246_s24 = smov 256   ;;  %s1247_s25 = smov 16  }
   0xb   :  { %28 = dma.hbm_to_vmem [thread:$0]  %s1553_s2, 2048, %s23_s22, [#allocation4], %s1246_s24, %s1246_s24, %s1247_s25  }
   0xc   :  { %1243 = dma.done.wait [#allocation4], 2048  }
   0xd   :  { %1244 = vsyncadd [#allocation4], 4294965248  ;;  %v1248_v0 = vmov 0.0   ;;  %v1290_v1 = vld [vmem:[#allocation3 + $0x78] sm:$0xff]  ;;  %v1292_v2 = vld [vmem:[#allocation3 + $0x70] sm:$0xff]  ;;  %vm62_vm0 = vcmask 1043456   ;;  %v43_v20 = vlaneseq }
   0xe   :  { %131 = vmatprep.mubr.f32.mxu0 %v1248_v0  ;;  %228 = vmatprep.mubr.f32.mxu1 %v1248_v0  ;;  %v1294_v3 = vld [vmem:[#allocation3 + $0x68] sm:$0xff]  ;;  %v1297_v4 = vld [vmem:[#allocation3 + $0x60] sm:$0xff]  ;;  %v1300_v5 = vld [vmem:[#allocation3 + $0x58] sm:$0xff]  ;;  %vm55_vm1 = vcmask 31744   ;;  %s1249_s8 = smov 64   ;;  %vm160_vm2 = vcmask 523264  }
   0xf   :  { %180 = vmatprep.subr.mxu1 %v1290_v1  ;;  %v1303_v6 = vld [vmem:[#allocation3 + $0x50] sm:$0xff]  ;;  %v40_v7 = vld [vmem:[%s1552_s1] sm:$0xff]  ;;  %v1309_v8 = vld [vmem:[#allocation3 + $0x48] sm:$0xff]  ;;  %v44_v21 = vshrl.u32 %v43_v20, 7  ;;  %vm1079_vm3 = vcmask 523270   ;;  %vm1086_vm4 = vcmask 7174  }
  0x10   :  { %181 = vmatpush1.msra.mxu1 %v1292_v2  ;;  %v54_v9 = vcombine.high %v40_v7, %v40_v7  ;;  %v1312_v10 = vld [vmem:[#allocation3 + $0x40] sm:$0xff]  ;;  %v1318_v12 = vld [vmem:[#allocation3 + $0x38] sm:$0xff]  ;;  %v1321_v13 = vld [vmem:[#allocation3 + $0x30] sm:$0xff] }
  0x11   :  { %182 = vmatprep.subr.mxu1 %v1294_v3  ;;  %v38_v11 = vld [vmem:[%s1551_s0] sm:$0xff]  ;;  %v1324_v14 = vld [vmem:[#allocation3 + $0x28] sm:$0xff]  ;;  %v1332_v16 = vld [vmem:[#allocation3 + $0x18] sm:$0xff]  ;;  %v49_v22 = vsub.s32 1, %v44_v21  ;;  %v45_v32 = vsub.s32 0, %v44_v21 }
  0x12   :  { %183 = vmatpush1.msra.mxu1 %v1297_v4  ;;  %1093 = vmatprep.subr.msk.mxu0 %vm62_vm0, %v54_v9  ;;  %v1328_v15 = vld [vmem:[#allocation3 + $0x20] sm:$0xff]  ;;  %v1336_v17 = vld [vmem:[#allocation3 + $0x10] sm:$0xff]  ;;  %v1340_v18 = vld [vmem:[#allocation3 + $0x8] sm:$0xff] }
  0x13   :  { %184 = vmatprep.subr.mxu1 %v1300_v5  ;;  %1094 = vmatpush1.msk.msra.mxu0 %vm62_vm0, %v40_v7  ;;  %v1344_v19 = vld [vmem:[#allocation3] sm:$0xff]  ;;  %v39_v42 = vld [vmem:[%s1551_s0 + $0x8] sm:$0xff] }
  0x14   :  { %185 = vmatpush1.msra.mxu1 %v1303_v6  ;;  %1095 = vmatmul.mubr.msk.f32.vlgmr.msra.gmra.mxu0 %vm55_vm1, %v38_v11  ;;  %v41_v23 = vld [vmem:[%s1554_s3] sm:$0x3] }
  0x15   :  { %186 = vmatprep.subr.mxu1 %v1309_v8  ;;  %286 = vmatprep.subr.mxu0 %v1290_v1  ;;  %v1385_v25 = vrot.slane %v41_v23, %v49_v22  ;;  %v1392_v33 = vrot.slane %v41_v23, %v45_v32 }
  0x16   :  { %187 = vmatpush1.msra.mxu1 %v1312_v10  ;;  %287 = vmatpush1.msra.mxu0 %v1292_v2 }
  0x17   :  { %188 = vmatprep.subr.mxu1 %v1318_v12  ;;  %288 = vmatprep.subr.mxu0 %v1294_v3 }
  0x18   :  { %189 = vmatpush1.msra.mxu1 %v1321_v13  ;;  %289 = vmatpush1.msra.mxu0 %v1297_v4 }
  0x19   :  { %190 = vmatprep.subr.mxu1 %v1324_v14  ;;  %290 = vmatprep.subr.mxu0 %v1300_v5 }
  0x1a   :  { %191 = vmatpush1.msra.mxu1 %v1328_v15  ;;  %291 = vmatpush1.msra.mxu0 %v1303_v6 }
  0x1b   :  { %192 = vmatprep.subr.mxu1 %v1332_v16  ;;  %292 = vmatprep.subr.mxu0 %v1309_v8 }
  0x1c   :  { %193 = vmatpush1.msra.mxu1 %v1336_v17  ;;  %293 = vmatpush1.msra.mxu0 %v1312_v10 }
  0x1d   :  { %194 = vmatprep.subr.mxu1 %v1340_v18  ;;  %294 = vmatprep.subr.mxu0 %v1318_v12 }
  0x1e   :  { %195 = vmatpush1.msra.mxu1 %v1344_v19  ;;  %137 = vmatprep.mubr.f32.mxu0 %v1248_v0 }
  0x1f   :  { %229 = vmatmul.mubr.f32.vlgmr.msra.gmra.mxu1 %v1248_v0  ;;  %295 = vmatpush1.msra.mxu0 %v1321_v13 }
  0x20   :  { %296 = vmatprep.subr.mxu0 %v1324_v14  ;;  %402 = vmatprep.subr.mxu1 %v1290_v1 }
  0x21   :  { %297 = vmatpush1.msra.mxu0 %v1328_v15  ;;  %403 = vmatpush1.msra.mxu1 %v1292_v2 }
  0x22   :  { %298 = vmatprep.subr.mxu0 %v1332_v16  ;;  %404 = vmatprep.subr.mxu1 %v1294_v3 }
  0x23   :  { %299 = vmatpush1.msra.mxu0 %v1336_v17  ;;  %405 = vmatpush1.msra.mxu1 %v1297_v4 }
  0x24   :  { %300 = vmatprep.subr.mxu0 %v1340_v18  ;;  %406 = vmatprep.subr.mxu1 %v1300_v5 }
  0x25   :  { %301 = vmatpush1.msra.mxu0 %v1344_v19  ;;  %407 = vmatpush1.msra.mxu1 %v1303_v6 }
  0x26   :  { %408 = vmatprep.subr.mxu1 %v1309_v8  ;;  %450 = vmatprep.mubr.f32.mxu1 %v1248_v0 }
  0x27   :  { %409 = vmatpush1.msra.mxu1 %v1312_v10  ;;  %518 = vmatprep.subr.mxu0 %v1290_v1 }
  0x28   :  { %410 = vmatprep.subr.mxu1 %v1318_v12  ;;  %1096 = vmatmul.mubr.msk.f32.gmra.mxu0 %vm55_vm1, %v39_v42 }
  0x29   :  { %411 = vmatpush1.msra.mxu1 %v1321_v13  ;;  %334 = vmatprep.mubr.f32.mxu0 %v1248_v0 }
  0x2a   :  { %412 = vmatprep.subr.mxu1 %v1324_v14 }
  0x2b   :  { %413 = vmatpush1.msra.mxu1 %v1328_v15 }
  0x2c   :  { %414 = vmatprep.subr.mxu1 %v1332_v16 }
  0x2d   :  { %415 = vmatpush1.msra.mxu1 %v1336_v17 }
  0x2e   :  { %416 = vmatprep.subr.mxu1 %v1340_v18 }
  0x2f   :  { %417 = vmatpush1.msra.mxu1 %v1344_v19 }
  0x30   :  { %634 = vmatprep.subr.mxu1 %v1290_v1 }
  0xd4   :  { %v133_v24 = vpop.f32.mrf.mxu0 }
  0xd5   :  { %v1395_v34 = vadd.f32 %v133_v24, %v1392_v33 }
  0xd6   :  { %v135_v26 = vpop.f32.mrf.mxu0 }
  0xd7   :  { %v1388_v28 = vadd.f32 %v135_v26, %v1385_v25 }
  0xdf   :  { %v230_v27 = vpop.f32.mrf.mxu1 }
  0xe0   :  { %v235_v35 = vadd.f32 %v230_v27, %v1395_v34 }
  0xe1   :  { %v232_v29 = vpop.f32.mrf.mxu1 }
  0xe2   :  { %v236_v30 = vadd.f32 %v232_v29, %v1388_v28  ;;  %v1097_v36 = vmul.f32 -1.442695, %v235_v35 }
  0xe4   :  { %1127 = vtanh.f32 %v236_v30  ;;  %v1098_v47 = vmul.f32 -1.442695, %v236_v30 }
  0xe5   :  { %1129 = vpow2.f32 %v1097_v36 }
  0xe8   :  { %v1423_v53 = vpop.f32.mrf.mxu0 }
  0xea   :  { %v1425_v54 = vpop.f32.mrf.mxu0 }
  0xf1   :  { %v1128_v31 = vpop.eup %1127 }
  0xf2   :  { %252 = vrot.lane.b32.xlu0 %v1128_v31, %s1249_s8  ;;  %v1130_v37 = vpop.eup %1129 }
  0xf3   :  { %v243_v38 = vadd.f32 1.0, %v1130_v37 }
  0xf5   :  { %1131 = vrcp.f32 %v243_v38 }
 0x102   :  { %v1132_v39 = vpop.eup %1131 }
 0x103   :  { %v250_v43 = vmul.f32 0.0, %v1132_v39 }
 0x164   :  { %v253_v40 = vpop.permute.xlu0 %252 }
 0x165   :  { %v255_v41 = vmul.f32 %v1132_v39, %v253_v40 }
 0x167   :  { %257 = vrot.lane.b32.xlu0 %v255_v41, %s1249_s8 }
 0x1d9   :  { %v258_v44 = vpop.permute.xlu0 %257 }
 0x1da   :  { %v260_v45 = vadd.f32 %v258_v44, %v250_v43 }
 0x1dc   :  { %1133 = vtanh.f32 %v260_v45  ;;  %v363_v21 = vrot.slane %v260_v45, 6 }
 0x1dd   :  { %1135 = vpow2.f32 %v1098_v47 }
 0x1e9   :  { %v1134_v46 = vpop.eup %1133 }
 0x1ea   :  { %263 = vrot.lane.b32.xlu1 %v1134_v46, %s1249_s8  ;;  %v1136_v48 = vpop.eup %1135 }
 0x1eb   :  { %v244_v49 = vadd.f32 1.0, %v1136_v48 }
 0x1ed   :  { %1137 = vrcp.f32 %v244_v49 }
 0x1fa   :  { %v1138_v50 = vpop.eup %1137 }
 0x25c   :  { %v264_v51 = vpop.permute.xlu1 %263 }
 0x25d   :  { %v266_v52 = vmul.f32 %v1138_v50, %v264_v51 }
 0x25f   :  { %1099 = vmatmul.mubr.msk.f32.vlgmr.msra.gmra.mxu0 %vm160_vm2, %v266_v52 }
 0x260   :  { %519 = vmatpush1.msra.mxu0 %v1292_v2  ;;  %566 = vmatprep.mubr.f32.mxu0 %v1248_v0 }
 0x261   :  { %520 = vmatprep.subr.mxu0 %v1294_v3 }
 0x262   :  { %521 = vmatpush1.msra.mxu0 %v1297_v4 }
 0x263   :  { %522 = vmatprep.subr.mxu0 %v1300_v5 }
 0x264   :  { %523 = vmatpush1.msra.mxu0 %v1303_v6 }
 0x265   :  { %524 = vmatprep.subr.mxu0 %v1309_v8 }
 0x266   :  { %525 = vmatpush1.msra.mxu0 %v1312_v10 }
 0x267   :  { %526 = vmatprep.subr.mxu0 %v1318_v12 }
 0x268   :  { %527 = vmatpush1.msra.mxu0 %v1321_v13 }
 0x269   :  { %528 = vmatprep.subr.mxu0 %v1324_v14 }
 0x26a   :  { %529 = vmatpush1.msra.mxu0 %v1328_v15 }
 0x26b   :  { %530 = vmatprep.subr.mxu0 %v1332_v16 }
 0x26c   :  { %531 = vmatpush1.msra.mxu0 %v1336_v17 }
 0x26d   :  { %532 = vmatprep.subr.mxu0 %v1340_v18 }
 0x26e   :  { %533 = vmatpush1.msra.mxu0 %v1344_v19 }
 0x26f   :  { %743 = vmatprep.subr.mxu0 %v1290_v1 }
 0x31f   :  { %v336_v55 = vpop.f32.mrf.mxu0 }
 0x320   :  { %v343_v60 = vrot.slane %v336_v55, 6 }
 0x321   :  { %v338_v56 = vpop.f32.mrf.mxu0 }
 0x322   :  { %v344_v57 = vrot.slane %v338_v56, 6  ;;  %v347_v61 = vadd.f32 %v343_v60, %v1395_v34 }
 0x324   :  { %v348_v58 = vadd.f32 %v344_v57, %v1388_v28  ;;  %v1100_v62 = vmul.f32 -1.442695, %v347_v61 }
 0x326   :  { %1139 = vtanh.f32 %v348_v58  ;;  %v1101_v27 = vmul.f32 -1.442695, %v348_v58 }
 0x327   :  { %1141 = vpow2.f32 %v1100_v62 }
 0x333   :  { %v1140_v59 = vpop.eup %1139 }
 0x334   :  { %367 = vrot.lane.b32.xlu1 %v1140_v59, %s1249_s8  ;;  %v1142_v63 = vpop.eup %1141 }
 0x335   :  { %v355_v7 = vadd.f32 1.0, %v1142_v63 }
 0x337   :  { %1143 = vrcp.f32 %v355_v7 }
 0x344   :  { %v1144_v9 = vpop.eup %1143 }
 0x345   :  { %v365_v22 = vmul.f32 %v1144_v9, %v363_v21 }
 0x3a6   :  { %v368_v11 = vpop.permute.xlu1 %367 }
 0x3a7   :  { %v370_v20 = vmul.f32 %v1144_v9, %v368_v11 }
 0x3a9   :  { %372 = vrot.lane.b32.xlu0 %v370_v20, %s1249_s8 }
 0x41b   :  { %v373_v23 = vpop.permute.xlu0 %372 }
 0x41c   :  { %v375_v24 = vadd.f32 %v373_v23, %v365_v22 }
 0x41e   :  { %1145 = vtanh.f32 %v375_v24  ;;  %v479_v50 = vrot.slane %v375_v24, 6 }
 0x41f   :  { %1147 = vpow2.f32 %v1101_v27 }
 0x42b   :  { %v1146_v26 = vpop.eup %1145 }
 0x42c   :  { %378 = vrot.lane.b32.xlu1 %v1146_v26, %s1249_s8  ;;  %v1148_v29 = vpop.eup %1147 }
 0x42d   :  { %v356_v30 = vadd.f32 1.0, %v1148_v29 }
 0x42f   :  { %1149 = vrcp.f32 %v356_v30 }
 0x43c   :  { %v1150_v31 = vpop.eup %1149 }
 0x49e   :  { %v379_v32 = vpop.permute.xlu1 %378 }
 0x49f   :  { %v381_v35 = vmul.f32 %v1150_v31, %v379_v32 }
 0x4a1   :  { %v383_v36 = vrot.slane %v381_v35, 2 }
 0x4a3   :  { %1102 = vmatmul.mubr.msk.f32.vlgmr.msra.gmra.mxu1 %vm160_vm2, %v383_v36 }
 0x4a4   :  { %635 = vmatpush1.msra.mxu1 %v1292_v2  ;;  %682 = vmatprep.mubr.f32.mxu1 %v1248_v0 }
 0x4a5   :  { %636 = vmatprep.subr.mxu1 %v1294_v3 }
 0x4a6   :  { %637 = vmatpush1.msra.mxu1 %v1297_v4 }
 0x4a7   :  { %638 = vmatprep.subr.mxu1 %v1300_v5 }
 0x4a8   :  { %639 = vmatpush1.msra.mxu1 %v1303_v6 }
 0x4a9   :  { %640 = vmatprep.subr.mxu1 %v1309_v8 }
 0x4aa   :  { %641 = vmatpush1.msra.mxu1 %v1312_v10 }
 0x4ab   :  { %642 = vmatprep.subr.mxu1 %v1318_v12 }
 0x4ac   :  { %643 = vmatpush1.msra.mxu1 %v1321_v13 }
 0x4ad   :  { %644 = vmatprep.subr.mxu1 %v1324_v14 }
 0x4ae   :  { %645 = vmatpush1.msra.mxu1 %v1328_v15 }
 0x4af   :  { %646 = vmatprep.subr.mxu1 %v1332_v16 }
 0x4b0   :  { %647 = vmatpush1.msra.mxu1 %v1336_v17 }
 0x4b1   :  { %648 = vmatprep.subr.mxu1 %v1340_v18 }
 0x4b2   :  { %649 = vmatpush1.msra.mxu1 %v1344_v19 }
 0x4b3   :  { %859 = vmatprep.subr.mxu1 %v1290_v1 }
 0x563   :  { %v452_v37 = vpop.f32.mrf.mxu1 }
 0x564   :  { %v459_v42 = vrot.slane %v452_v37, 4 }
 0x565   :  { %v454_v38 = vpop.f32.mrf.mxu1 }
 0x566   :  { %v460_v39 = vrot.slane %v454_v38, 4  ;;  %v463_v43 = vadd.f32 %v459_v42, %v1395_v34 }
 0x568   :  { %v464_v40 = vadd.f32 %v460_v39, %v1388_v28  ;;  %v1103_v44 = vmul.f32 -1.442695, %v463_v43 }
 0x56a   :  { %1151 = vtanh.f32 %v464_v40  ;;  %v1104_v57 = vmul.f32 -1.442695, %v464_v40 }
 0x56b   :  { %1153 = vpow2.f32 %v1103_v44  ;;  %v1497_v44 = vadd.f32 %v1425_v54, %v1385_v25 }
 0x577   :  { %v1152_v41 = vpop.eup %1151 }
 0x578   :  { %483 = vrot.lane.b32.xlu0 %v1152_v41, %s1249_s8  ;;  %v1154_v45 = vpop.eup %1153 }
 0x579   :  { %v471_v46 = vadd.f32 1.0, %v1154_v45 }
 0x57b   :  { %1155 = vrcp.f32 %v471_v46 }
 0x588   :  { %v1156_v47 = vpop.eup %1155 }
 0x589   :  { %v481_v51 = vmul.f32 %v1156_v47, %v479_v50 }
 0x5ea   :  { %v484_v48 = vpop.permute.xlu0 %483 }
 0x5eb   :  { %v486_v49 = vmul.f32 %v1156_v47, %v484_v48  ;;  %v1503_v48 = vadd.f32 %v1423_v53, %v1392_v33 }
 0x5ed   :  { %488 = vrot.lane.b32.xlu1 %v486_v49, %s1249_s8 }
 0x65f   :  { %v489_v52 = vpop.permute.xlu1 %488 }
 0x660   :  { %v491_v55 = vadd.f32 %v489_v52, %v481_v51 }
 0x662   :  { %1157 = vtanh.f32 %v491_v55  ;;  %v595_v31 = vrot.slane %v491_v55, 6 }
 0x663   :  { %1159 = vpow2.f32 %v1104_v57 }
 0x66f   :  { %v1158_v56 = vpop.eup %1157 }
 0x670   :  { %494 = vrot.lane.b32.xlu0 %v1158_v56, %s1249_s8  ;;  %v1160_v58 = vpop.eup %1159 }
 0x671   :  { %v472_v59 = vadd.f32 1.0, %v1160_v58 }
 0x673   :  { %1161 = vrcp.f32 %v472_v59 }
 0x680   :  { %v1162_v60 = vpop.eup %1161 }
 0x6e2   :  { %v495_v61 = vpop.permute.xlu0 %494 }
 0x6e3   :  { %v497_v62 = vmul.f32 %v1162_v60, %v495_v61 }
 0x6e5   :  { %v499_v63 = vrot.slane %v497_v62, 4 }
 0x6e7   :  { %1105 = vmatmul.mubr.msk.f32.vlgmr.msra.gmra.mxu0 %vm160_vm2, %v499_v63 }
 0x6e8   :  { %744 = vmatpush1.msra.mxu0 %v1292_v2  ;;  %791 = vmatprep.mubr.f32.mxu0 %v1248_v0 }
 0x6e9   :  { %745 = vmatprep.subr.mxu0 %v1294_v3 }
 0x6ea   :  { %746 = vmatpush1.msra.mxu0 %v1297_v4 }
 0x6eb   :  { %747 = vmatprep.subr.mxu0 %v1300_v5 }
 0x6ec   :  { %748 = vmatpush1.msra.mxu0 %v1303_v6 }
 0x6ed   :  { %749 = vmatprep.subr.mxu0 %v1309_v8 }
 0x6ee   :  { %750 = vmatpush1.msra.mxu0 %v1312_v10 }
 0x6ef   :  { %751 = vmatprep.subr.mxu0 %v1318_v12 }
 0x6f0   :  { %752 = vmatpush1.msra.mxu0 %v1321_v13 }
 0x6f1   :  { %753 = vmatprep.subr.mxu0 %v1324_v14 }
 0x6f2   :  { %754 = vmatpush1.msra.mxu0 %v1328_v15 }
 0x6f3   :  { %755 = vmatprep.subr.mxu0 %v1332_v16 }
 0x6f4   :  { %756 = vmatpush1.msra.mxu0 %v1336_v17 }
 0x6f5   :  { %757 = vmatprep.subr.mxu0 %v1340_v18 }
 0x6f6   :  { %758 = vmatpush1.msra.mxu0 %v1344_v19 }
 0x6f7   :  { %975 = vmatprep.subr.mxu0 %v1290_v1 }
 0x7a7   :  { %v568_v7 = vpop.f32.mrf.mxu0 }
 0x7a8   :  { %v575_v22 = vrot.slane %v568_v7, 2 }
 0x7a9   :  { %v570_v9 = vpop.f32.mrf.mxu0 }
 0x7aa   :  { %v576_v11 = vrot.slane %v570_v9, 2  ;;  %v579_v23 = vadd.f32 %v575_v22, %v1395_v34 }
 0x7ac   :  { %v580_v20 = vadd.f32 %v576_v11, %v1388_v28  ;;  %v1106_v24 = vmul.f32 -1.442695, %v579_v23 }
 0x7ae   :  { %1163 = vtanh.f32 %v580_v20  ;;  %v1107_v37 = vmul.f32 -1.442695, %v580_v20 }
 0x7af   :  { %1165 = vpow2.f32 %v1106_v24 }
 0x7bb   :  { %v1164_v21 = vpop.eup %1163 }
 0x7bc   :  { %599 = vrot.lane.b32.xlu1 %v1164_v21, %s1249_s8  ;;  %v1166_v26 = vpop.eup %1165 }
 0x7bd   :  { %v587_v27 = vadd.f32 1.0, %v1166_v26 }
 0x7bf   :  { %1167 = vrcp.f32 %v587_v27 }
 0x7cc   :  { %v1168_v29 = vpop.eup %1167 }
 0x7cd   :  { %v597_v32 = vmul.f32 %v1168_v29, %v595_v31 }
 0x82e   :  { %v600_v30 = vpop.permute.xlu1 %599 }
 0x82f   :  { %v602_v1 = vmul.f32 %v1168_v29, %v600_v30 }
 0x831   :  { %604 = vrot.lane.b32.xlu0 %v602_v1, %s1249_s8 }
 0x8a3   :  { %v605_v28 = vpop.permute.xlu0 %604 }
 0x8a4   :  { %v607_v35 = vadd.f32 %v605_v28, %v597_v32 }
 0x8a6   :  { %1169 = vtanh.f32 %v607_v35  ;;  %v705_v56 = vrot.slane %v607_v35, 6 }
 0x8a7   :  { %1171 = vpow2.f32 %v1107_v37 }
 0x8b3   :  { %v1170_v36 = vpop.eup %1169 }
 0x8b4   :  { %610 = vrot.lane.b32.xlu1 %v1170_v36, %s1249_s8  ;;  %v1172_v34 = vpop.eup %1171 }
 0x8b5   :  { %v588_v38 = vadd.f32 1.0, %v1172_v34 }
 0x8b7   :  { %1173 = vrcp.f32 %v588_v38 }
 0x8c4   :  { %v1174_v39 = vpop.eup %1173 }
 0x926   :  { %v611_v40 = vpop.permute.xlu1 %610 }
 0x927   :  { %v613_v41 = vmul.f32 %v1174_v39, %v611_v40 }
 0x929   :  { %v615_v42 = vrot.slane %v613_v41, 6 }
 0x92b   :  { %1108 = vmatmul.mubr.msk.f32.vlgmr.msra.gmra.mxu1 %vm160_vm2, %v615_v42 }
 0x92c   :  { %860 = vmatpush1.msra.mxu1 %v1292_v2  ;;  %907 = vmatprep.mubr.f32.mxu1 %v1248_v0 }
 0x92d   :  { %861 = vmatprep.subr.mxu1 %v1294_v3 }
 0x92e   :  { %862 = vmatpush1.msra.mxu1 %v1297_v4 }
 0x92f   :  { %863 = vmatprep.subr.mxu1 %v1300_v5 }
 0x930   :  { %864 = vmatpush1.msra.mxu1 %v1303_v6 }
 0x931   :  { %865 = vmatprep.subr.mxu1 %v1309_v8 }
 0x932   :  { %866 = vmatpush1.msra.mxu1 %v1312_v10 }
 0x933   :  { %867 = vmatprep.subr.mxu1 %v1318_v12 }
 0x934   :  { %868 = vmatpush1.msra.mxu1 %v1321_v13 }
 0x935   :  { %869 = vmatprep.subr.mxu1 %v1324_v14 }
 0x936   :  { %870 = vmatpush1.msra.mxu1 %v1328_v15 }
 0x937   :  { %871 = vmatprep.subr.mxu1 %v1332_v16 }
 0x938   :  { %872 = vmatpush1.msra.mxu1 %v1336_v17 }
 0x939   :  { %873 = vmatprep.subr.mxu1 %v1340_v18 }
 0x93a   :  { %874 = vmatpush1.msra.mxu1 %v1344_v19 }
 0x9eb   :  { %v684_v43 = vpop.f32.mrf.mxu1 }
 0x9ec   :  { %v689_v49 = vadd.f32 %v684_v43, %v1503_v48 }
 0x9ed   :  { %v686_v45 = vpop.f32.mrf.mxu1 }
 0x9ee   :  { %v690_v46 = vadd.f32 %v686_v45, %v1497_v44  ;;  %v1109_v50 = vmul.f32 -1.442695, %v689_v49 }
 0x9f0   :  { %1175 = vtanh.f32 %v690_v46  ;;  %v1110_v33 = vmul.f32 -1.442695, %v690_v46 }
 0x9f1   :  { %1177 = vpow2.f32 %v1109_v50 }
 0x9fd   :  { %v1176_v47 = vpop.eup %1175 }
 0x9fe   :  { %709 = vrot.lane.b32.xlu0 %v1176_v47, %s1249_s8  ;;  %v1178_v51 = vpop.eup %1177 }
 0x9ff   :  { %v697_v52 = vadd.f32 1.0, %v1178_v51 }
 0xa01   :  { %1179 = vrcp.f32 %v697_v52 }
 0xa0e   :  { %v1180_v25 = vpop.eup %1179 }
 0xa0f   :  { %v707_v57 = vmul.f32 %v1180_v25, %v705_v56 }
 0xa70   :  { %v710_v54 = vpop.permute.xlu0 %709 }
 0xa71   :  { %v712_v55 = vmul.f32 %v1180_v25, %v710_v54 }
 0xa73   :  { %714 = vrot.lane.b32.xlu1 %v712_v55, %s1249_s8 }
 0xae5   :  { %v715_v58 = vpop.permute.xlu1 %714 }
 0xae6   :  { %v717_v59 = vadd.f32 %v715_v58, %v707_v57 }
 0xae8   :  { %1181 = vtanh.f32 %v717_v59 }
 0xae9   :  { %1183 = vpow2.f32 %v1110_v33 }
 0xaf5   :  { %v1182_v60 = vpop.eup %1181 }
 0xaf6   :  { %720 = vrot.lane.b32.xlu0 %v1182_v60, %s1249_s8  ;;  %v1184_v53 = vpop.eup %1183 }
 0xaf7   :  { %v698_v61 = vadd.f32 1.0, %v1184_v53 }
 0xaf9   :  { %1185 = vrcp.f32 %v698_v61 }
 0xb06   :  { %v1186_v62 = vpop.eup %1185 }
 0xb68   :  { %v721_v63 = vpop.permute.xlu0 %720 }
 0xb69   :  { %v723_v7 = vmul.f32 %v1186_v62, %v721_v63 }
 0xb6b   :  { %1111 = vmatmul.mubr.msk.f32.vlgmr.msra.gmra.mxu0 %vm160_vm2, %v723_v7 }
 0xb6c   :  { %976 = vmatpush1.msra.mxu0 %v1292_v2  ;;  %1023 = vmatprep.mubr.f32.mxu0 %v1248_v0 }
 0xb6d   :  { %977 = vmatprep.subr.mxu0 %v1294_v3 }
 0xb6e   :  { %978 = vmatpush1.msra.mxu0 %v1297_v4 }
 0xb6f   :  { %979 = vmatprep.subr.mxu0 %v1300_v5 }
 0xb70   :  { %980 = vmatpush1.msra.mxu0 %v1303_v6 }
 0xb71   :  { %981 = vmatprep.subr.mxu0 %v1309_v8 }
 0xb72   :  { %982 = vmatpush1.msra.mxu0 %v1312_v10 }
 0xb73   :  { %983 = vmatprep.subr.mxu0 %v1318_v12 }
 0xb74   :  { %984 = vmatpush1.msra.mxu0 %v1321_v13 }
 0xb75   :  { %985 = vmatprep.subr.mxu0 %v1324_v14 }
 0xb76   :  { %986 = vmatpush1.msra.mxu0 %v1328_v15 }
 0xb77   :  { %987 = vmatprep.subr.mxu0 %v1332_v16 }
 0xb78   :  { %988 = vmatpush1.msra.mxu0 %v1336_v17  ;;  %v820_v17 = vrot.slane %v717_v59, 6 }
 0xb79   :  { %989 = vmatprep.subr.mxu0 %v1340_v18 }
 0xb7a   :  { %990 = vmatpush1.msra.mxu0 %v1344_v19 }
 0xc2b   :  { %v793_v0 = vpop.f32.mrf.mxu0 }
 0xc2c   :  { %v800_v6 = vrot.slane %v793_v0, 6 }
 0xc2d   :  { %v795_v2 = vpop.f32.mrf.mxu0 }
 0xc2e   :  { %v801_v3 = vrot.slane %v795_v2, 6  ;;  %v804_v8 = vadd.f32 %v800_v6, %v1503_v48 }
 0xc30   :  { %v805_v4 = vadd.f32 %v801_v3, %v1497_v44  ;;  %v1112_v10 = vmul.f32 -1.442695, %v804_v8 }
 0xc32   :  { %1187 = vtanh.f32 %v805_v4  ;;  %v1113_v20 = vmul.f32 -1.442695, %v805_v4 }
 0xc33   :  { %1189 = vpow2.f32 %v1112_v10 }
 0xc3f   :  { %v1188_v5 = vpop.eup %1187 }
 0xc40   :  { %824 = vrot.lane.b32.xlu1 %v1188_v5, %s1249_s8  ;;  %v1190_v12 = vpop.eup %1189 }
 0xc41   :  { %v812_v13 = vadd.f32 1.0, %v1190_v12 }
 0xc43   :  { %1191 = vrcp.f32 %v812_v13  ;;  %v1120_v13 = vld [vmem:[%s1555_s4] ss:$0 sm:$0xff] }
 0xc50   :  { %v1192_v14 = vpop.eup %1191 }
 0xc51   :  { %v822_v18 = vmul.f32 %v1192_v14, %v820_v17  ;;  %v1084_v17 = vstv %s1556_s5 }
 0xcb2   :  { %v825_v15 = vpop.permute.xlu1 %824 }
 0xcb3   :  { %v827_v16 = vmul.f32 %v1192_v14, %v825_v15 }
 0xcb5   :  { %829 = vrot.lane.b32.xlu0 %v827_v16, %s1249_s8 }
 0xd27   :  { %v830_v19 = vpop.permute.xlu0 %829 }
 0xd28   :  { %v832_v9 = vadd.f32 %v830_v19, %v822_v18 }
 0xd2a   :  { %1193 = vtanh.f32 %v832_v9  ;;  %v936_v41 = vrot.slane %v832_v9, 6 }
 0xd2b   :  { %1195 = vpow2.f32 %v1113_v20 }
 0xd37   :  { %v1194_v11 = vpop.eup %1193 }
 0xd38   :  { %835 = vrot.lane.b32.xlu1 %v1194_v11, %s1249_s8  ;;  %v1196_v21 = vpop.eup %1195 }
 0xd39   :  { %v813_v22 = vadd.f32 1.0, %v1196_v21 }
 0xd3b   :  { %1197 = vrcp.f32 %v813_v22 }
 0xd48   :  { %v1198_v23 = vpop.eup %1197 }
 0xdaa   :  { %v836_v24 = vpop.permute.xlu1 %835 }
 0xdab   :  { %v838_v26 = vmul.f32 %v1198_v23, %v836_v24 }
 0xdad   :  { %v840_v27 = vrot.slane %v838_v26, 2 }
 0xdaf   :  { %1114 = vmatmul.mubr.msk.f32.vlgmr.msra.gmra.mxu1 %vm160_vm2, %v840_v27 }
 0xe6f   :  { %v909_v29 = vpop.f32.mrf.mxu1 }
 0xe70   :  { %v916_v28 = vrot.slane %v909_v29, 4 }
 0xe71   :  { %v911_v30 = vpop.f32.mrf.mxu1 }
 0xe72   :  { %v917_v1 = vrot.slane %v911_v30, 4  ;;  %v920_v35 = vadd.f32 %v916_v28, %v1503_v48 }
 0xe74   :  { %v921_v31 = vadd.f32 %v917_v1, %v1497_v44  ;;  %v1115_v36 = vmul.f32 -1.442695, %v920_v35 }
 0xe76   :  { %1199 = vtanh.f32 %v921_v31  ;;  %v1116_v47 = vmul.f32 -1.442695, %v921_v31 }
 0xe77   :  { %1201 = vpow2.f32 %v1115_v36 }
 0xe83   :  { %v1200_v32 = vpop.eup %1199 }
 0xe84   :  { %940 = vrot.lane.b32.xlu0 %v1200_v32, %s1249_s8  ;;  %v1202_v37 = vpop.eup %1201 }
 0xe85   :  { %v928_v34 = vadd.f32 1.0, %v1202_v37 }
 0xe87   :  { %1203 = vrcp.f32 %v928_v34 }
 0xe94   :  { %v1204_v38 = vpop.eup %1203 }
 0xe95   :  { %v938_v42 = vmul.f32 %v1204_v38, %v936_v41 }
 0xef6   :  { %v941_v39 = vpop.permute.xlu0 %940 }
 0xef7   :  { %v943_v40 = vmul.f32 %v1204_v38, %v941_v39 }
 0xef9   :  { %945 = vrot.lane.b32.xlu1 %v943_v40, %s1249_s8 }
 0xf6b   :  { %v946_v43 = vpop.permute.xlu1 %945 }
 0xf6c   :  { %v948_v45 = vadd.f32 %v946_v43, %v938_v42 }
 0xf6e   :  { %1205 = vtanh.f32 %v948_v45  ;;  %v1052_v2 = vrot.slane %v948_v45, 6 }
 0xf6f   :  { %1207 = vpow2.f32 %v1116_v47 }
 0xf7b   :  { %v1206_v46 = vpop.eup %1205 }
 0xf7c   :  { %951 = vrot.lane.b32.xlu0 %v1206_v46, %s1249_s8  ;;  %v1208_v49 = vpop.eup %1207 }
 0xf7d   :  { %v929_v50 = vadd.f32 1.0, %v1208_v49 }
 0xf7f   :  { %1209 = vrcp.f32 %v929_v50 }
 0xf8c   :  { %v1210_v51 = vpop.eup %1209 }
 0xfee   :  { %v952_v52 = vpop.permute.xlu0 %951 }
 0xfef   :  { %v954_v25 = vmul.f32 %v1210_v51, %v952_v52 }
 0xff1   :  { %v956_v54 = vrot.slane %v954_v25, 4 }
 0xff3   :  { %1117 = vmatmul.mubr.msk.f32.vlgmr.msra.gmra.mxu0 %vm160_vm2, %v956_v54 }
0x10b3   :  { %v1025_v55 = vpop.f32.mrf.mxu0 }
0x10b4   :  { %v1032_v60 = vrot.slane %v1025_v55, 2 }
0x10b5   :  { %v1027_v56 = vpop.f32.mrf.mxu0 }
0x10b6   :  { %v1033_v57 = vrot.slane %v1027_v56, 2  ;;  %v1036_v33 = vadd.f32 %v1032_v60, %v1503_v48 }
0x10b8   :  { %v1037_v58 = vadd.f32 %v1033_v57, %v1497_v44  ;;  %v1118_v53 = vmul.f32 -1.442695, %v1036_v33 }
0x10ba   :  { %1211 = vtanh.f32 %v1037_v58  ;;  %v1119_v6 = vmul.f32 -1.442695, %v1037_v58 }
0x10bb   :  { %1213 = vpow2.f32 %v1118_v53 }
0x10c7   :  { %v1212_v59 = vpop.eup %1211 }
0x10c8   :  { %1056 = vrot.lane.b32.xlu1 %v1212_v59, %s1249_s8  ;;  %v1214_v61 = vpop.eup %1213 }
0x10c9   :  { %v1044_v62 = vadd.f32 1.0, %v1214_v61 }
0x10cb   :  { %1215 = vrcp.f32 %v1044_v62 }
0x10d8   :  { %v1216_v63 = vpop.eup %1215 }
0x10d9   :  { %v1054_v3 = vmul.f32 %v1216_v63, %v1052_v2 }
0x113a   :  { %v1057_v7 = vpop.permute.xlu1 %1056 }
0x113b   :  { %v1059_v0 = vmul.f32 %v1216_v63, %v1057_v7 }
0x113d   :  { %1061 = vrot.lane.b32.xlu0 %v1059_v0, %s1249_s8 }
0x11af   :  { %v1062_v44 = vpop.permute.xlu0 %1061 }
0x11b0   :  { %v1064_v4 = vadd.f32 %v1062_v44, %v1054_v3 }
0x11b2   :  { %1217 = vtanh.f32 %v1064_v4 }
0x11b3   :  { %1219 = vpow2.f32 %v1119_v6 }
0x11bf   :  { %v1218_v5 = vpop.eup %1217 }
0x11c0   :  { %1067 = vrot.lane.b32.xlu1 %v1218_v5, %s1249_s8  ;;  %v1220_v48 = vpop.eup %1219 }
0x11c1   :  { %v1045_v8 = vadd.f32 1.0, %v1220_v48 }
0x11c3   :  { %1221 = vrcp.f32 %v1045_v8 }
0x11d0   :  { %v1222_v10 = vpop.eup %1221 }
0x1232   :  { %v1068_v12 = vpop.permute.xlu1 %1067 }
0x1233   :  { %v1070_v14 = vmul.f32 %v1222_v10, %v1068_v12 }
0x1235   :  { %v1078_v15 = vmul.f32 %v1120_v13, %v1070_v14 }
0x1237   :  { %v1080_v16 = vsel %vm1079_vm3, %v1078_v15, 0.0 }
0x1238   :  { %1081 = vadd.xlane.f32.xlu0 %v1080_v16 }
0x12c1   :  { %v1082_v18 = vpop.xlane.xlu0 %1081 }
0x12c2   :  { %v1085_v19 = vadd.f32 %v1084_v17, %v1082_v18 }
0x12c4   :  { %1087 = vst.msk [vmem:[%s1557_s6 - $0x6] sm:$0xc0] %vm1086_vm4, %v1085_v19 }
0x12c5   :  { %1092 = vsyncpa [#allocation4], 1 }

</bundles_post_ra>
